<compile_context>
chip_gen: v7x
topology: tpu7x:2x2x1
jax: 0.10.0
libtpu: 0.0.40
codegen_flags: <defaults>
</compile_context>

<pallas_src>
import functools

import jax
import jax.numpy as jnp
from jax.experimental import pallas as pl
from jax.experimental.pallas import tpu as pltpu


LANE = 128     # TPU lane width: hidden/output feature axes padded to this
SUBLANE = 8    # f32 sublane width: batch tiles are multiples of this


def _round_up(n, m):
    return ((n + m - 1) // m) * m


@functools.lru_cache(maxsize=1)
def _chip_config():
    """Generation-dependent knobs: (max BM, activation dtype, #cores, VMEM cap)."""
    kind = ""
    try:
        kind = jax.devices()[0].device_kind.lower()
    except Exception:
        pass
    newer = ("v6" in kind) or ("v7" in kind)
    max_bm = 256 if newer else 128                    # v6e/v7x MXU 2x256^2; v5e 4x128^2
    act_dtype = jnp.bfloat16 if newer else jnp.float32  # v5e VPU has no bf16
    two_cores = ("v7" in kind) or ("v4" in kind) or ("v5p" in kind)
    try:
        vmem_cap = int(pltpu.get_tpu_info().vmem_capacity_bytes)
    except Exception:
        vmem_cap = 64 * 1024 * 1024                   # conservative: v7x per-TC VMEM
    return max_bm, act_dtype, (2 if two_cores else 1), vmem_cap


# ----------------------------- Fused kernel -----------------------------

def _make_fused_mlp_kernel(num_layers, out_valid, act_dtype):
    """Ref order: x_ref, w0, b0, w1, b1, ..., o_ref.
    Weights are pre-padded (K, N_pad) bf16; biases are (1, N_pad) f32."""

    def kernel(x_ref, *refs):
        o_ref = refs[-1]
        h = x_ref[...]                                   # (BM, in_f) f32
        for layer in range(num_layers):                  # statically unrolled
            w = refs[2 * layer][...]                     # (K, N_pad) bf16
            b = refs[2 * layer + 1][...]                 # (1, N_pad) f32
            # bf16 operands on the MXU, f32 accumulation.
            y = jnp.dot(h.astype(jnp.bfloat16), w,
                        preferred_element_type=jnp.float32)
            y = y + b                                    # f32 epilogue (VPU)
            if layer < num_layers - 1:
                h = jnp.maximum(y, 0.0).astype(act_dtype)   # ReLU (+ bf16 on v6e/v7x)
                # dropout (inference / eval mode) == identity
            else:
                # Mask padded logit lanes to -inf before max/sum so the
                # softmax normalizer only sees the real classes.
                lane = jax.lax.broadcasted_iota(jnp.int32, y.shape, 1)
                valid = lane < out_valid
                y = jnp.where(valid, y, -jnp.inf)
                m = jnp.max(y, axis=1, keepdims=True)                      # XLU
                s = y - m
                lse = jnp.log(jnp.sum(jnp.exp(s), axis=1, keepdims=True))  # EUP
                # Write 0.0 (finite) in the padded lanes, not -inf.
                o_ref[...] = jnp.where(valid, s - lse, 0.0).astype(o_ref.dtype)

    return kernel


# ----------------------------- Param prep (once) -----------------------------

def prepare_params(params):
    """One-time lane padding + bf16 cast, hoisted out of the per-call path.

    params: list of (W (in, out) f32, b (out,) f32).  The first layer's K dim is
    left unpadded (it must match the raw input feature count); all other axes
    are padded to multiples of 128 lanes with zeros.
    """
    prepped = []
    for idx, (w, b) in enumerate(params):
        k, n = w.shape
        k_p = k if idx == 0 else _round_up(k, LANE)
        n_p = _round_up(n, LANE)
        w_p = (jnp.zeros((k_p, n_p), jnp.bfloat16)
               .at[:k, :n].set(w.astype(jnp.bfloat16)))
        b_p = jnp.zeros((1, n_p), jnp.float32).at[:, :n].set(b.reshape(1, -1))
        prepped.append((w_p, b_p))
    return prepped


# ----------------------------- Host wrapper -----------------------------

@functools.partial(jax.jit, static_argnames=("output_size", "single_buffer_weights"))
def neural_network_forward(x, prepped, output_size, single_buffer_weights=True):
    """x: (batch, input_size) f32; prepped: output of prepare_params()."""
    batch, in_f = x.shape
    num_layers = len(prepped)
    assert prepped[0][0].shape[0] == in_f, "params not prepared for this input size"
    max_bm, act_dtype, n_cores, vmem_cap = _chip_config()

    # ---- adaptive batch tiling ------------------------------------------
    bm = min(max_bm, _round_up(max(batch, 1), SUBLANE))
    b_pad = _round_up(max(batch, 1), bm)
    # Give both TensorCores work on 2-core chips (v7x) when the batch allows.
    while n_cores > 1 and (b_pad // bm) < n_cores and bm % (2 * SUBLANE) == 0:
        bm //= 2
        b_pad = _round_up(max(batch, 1), bm)

    if b_pad != batch:
        x_in = jnp.zeros((b_pad, in_f), jnp.float32).at[:batch].set(
            x.astype(jnp.float32))
    else:
        x_in = x.astype(jnp.float32)          # no host-side batch pad needed

    out_pad = prepped[-1][0].shape[1]
    kernel = _make_fused_mlp_kernel(num_layers, output_size, act_dtype)

    # Weights/biases: constant block index -> resident in VMEM; single-buffer
    # them (no double-buffering) when the Buffered pipeline mode is available.
    can_single_buffer = single_buffer_weights and hasattr(pl, "Buffered")
    wb_kwargs = {"pipeline_mode": pl.Buffered(1)} if can_single_buffer else {}

    in_specs = [pl.BlockSpec((bm, in_f), lambda i: (i, 0))]
    flat_params = []
    for (w_p, b_p) in prepped:
        in_specs.append(pl.BlockSpec(w_p.shape, lambda i: (0, 0), **wb_kwargs))
        in_specs.append(pl.BlockSpec(b_p.shape, lambda i: (0, 0), **wb_kwargs))
        flat_params.extend([w_p, b_p])

    # ---- explicit VMEM budget -------------------------------------------
    wb_bytes = sum(w.size * 2 + b.size * 4 for (w, b) in prepped)
    wb_buffers = 1 if can_single_buffer else 2
    widest = max(w.shape[1] for (w, _) in prepped)
    need = (wb_bytes * wb_buffers            # resident weights / biases
            + 2 * bm * in_f * 4              # double-buffered x tiles
            + 2 * bm * out_pad * 4           # double-buffered out tiles
            + 4 * bm * widest * 4            # activation / accumulator headroom
            + (2 << 20))
    vmem_limit = int(min(max(need, 32 << 20), int(vmem_cap * 0.9)))

    flops = 2 * b_pad * sum(w.shape[0] * w.shape[1] for (w, _) in prepped)
    bytes_accessed = (b_pad * in_f * 4 + b_pad * out_pad * 4
                      + sum(w.size * 2 + b.size * 4 for (w, b) in prepped))
    cost = pl.CostEstimate(flops=flops,
                           transcendentals=b_pad * (out_pad + 1),
                           bytes_accessed=bytes_accessed)

    out_p = pl.pallas_call(
        kernel,
        out_shape=jax.ShapeDtypeStruct((b_pad, out_pad), jnp.float32),
        grid=(b_pad // bm,),
        in_specs=in_specs,
        out_specs=pl.BlockSpec((bm, out_pad), lambda i: (i, 0)),
        compiler_params=pltpu.CompilerParams(
            dimension_semantics=("parallel",),
            vmem_limit_bytes=vmem_limit),
        cost_estimate=cost,
    )(x_in, *flat_params)

    return out_p[:batch, :output_size]


# ----------------------------- Params & reference -----------------------------

def init_params(key, input_size, output_size, hidden_layers):
    """Deterministic parameter init. Weights stored as (in, out)."""
    sizes = [input_size] + list(hidden_layers) + [output_size]
    params = []
    for i in range(len(sizes) - 1):
        fan_in, fan_out = sizes[i], sizes[i + 1]
        key, kw, kb = jax.random.split(key, 3)
        bound = 1.0 / jnp.sqrt(fan_in)
        w = jax.random.uniform(kw, (fan_in, fan_out), jnp.float32, -bound, bound)
        b = jax.random.uniform(kb, (fan_out,), jnp.float32, -bound, bound)
        params.append((w, b))
    return params


def _reference_forward(x, params):
    """Pure-JAX reference mirroring the kernel math (bf16 operands, f32 acc)."""
    h = x
    for i, (w, b) in enumerate(params):
        y = jnp.dot(h.astype(jnp.bfloat16), w.astype(jnp.bfloat16),
                    preferred_element_type=jnp.float32) + b.reshape(1, -1)
        if i < len(params) - 1:
            h = jnp.maximum(y, 0.0)
        else:
            return jax.nn.log_softmax(y, axis=1)


# ----------------------------- Main -----------------------------

if __name__ == "__main__":
    batch = 8
    input_size = 32
    hidden_layers = [64, 32]
    output_size = 16
    drop = 0.5  # unused at inference (dropout == identity)

    key = jax.random.PRNGKey(0)
    key, kx = jax.random.split(key)
    x = jax.random.normal(kx, (batch, input_size), dtype=jnp.float32)

    params = init_params(key, input_size, output_size, hidden_layers)
    prepped = prepare_params(params)   # pad + bf16 cast ONCE, outside forward

    try:
        out = jax.block_until_ready(
            neural_network_forward(x, prepped, output_size,
                                   single_buffer_weights=True))
    except Exception:
        # Fallback if Buffered(1) single-buffering is unsupported by this
        # jax/libtpu version: default double-buffered weight specs.
        out = jax.block_until_ready(
            neural_network_forward(x, prepped, output_size,
                                   single_buffer_weights=False))

    ref = _reference_forward(x, params)
    assert out.shape == (batch, output_size)
    assert bool(jnp.all(jnp.isfinite(out))), "non-finite output"
    assert jnp.allclose(out, ref, atol=1e-4, rtol=1e-4), "mismatch vs reference"

    print("KERNEL_OK")
</pallas_src>

<mosaic_0001>
module attributes {stable_mosaic.version = 11 : i64} {
  func.func @kernel(%arg0: i32, %arg1: memref<8x32xf32, #tpu.memory_space<vmem>>, %arg2: memref<32x128xbf16, #tpu.memory_space<vmem>>, %arg3: memref<1x128xf32, #tpu.memory_space<vmem>>, %arg4: memref<128x128xbf16, #tpu.memory_space<vmem>>, %arg5: memref<1x128xf32, #tpu.memory_space<vmem>>, %arg6: memref<128x128xbf16, #tpu.memory_space<vmem>>, %arg7: memref<1x128xf32, #tpu.memory_space<vmem>>, %arg8: memref<8x128xf32, #tpu.memory_space<vmem>>) attributes {dimension_semantics = [#tpu.dimension_semantics<parallel>], iteration_bounds = array<i64: 1>, scalar_prefetch = 0 : i64, scratch_operands = 0 : i64, tpu.core_type = #tpu.core_type<tc>, window_params = [{transform_indices = @transform_0, window_bounds = array<i64: 8, 32>}, {pipeline_mode = #tpu.pipeline_mode<synchronous>, transform_indices = @transform_1, window_bounds = array<i64: 32, 128>}, {pipeline_mode = #tpu.pipeline_mode<synchronous>, transform_indices = @transform_2, window_bounds = array<i64: 1, 128>}, {pipeline_mode = #tpu.pipeline_mode<synchronous>, transform_indices = @transform_3, window_bounds = array<i64: 128, 128>}, {pipeline_mode = #tpu.pipeline_mode<synchronous>, transform_indices = @transform_4, window_bounds = array<i64: 1, 128>}, {pipeline_mode = #tpu.pipeline_mode<synchronous>, transform_indices = @transform_5, window_bounds = array<i64: 128, 128>}, {pipeline_mode = #tpu.pipeline_mode<synchronous>, transform_indices = @transform_6, window_bounds = array<i64: 1, 128>}, {transform_indices = @transform_7, window_bounds = array<i64: 8, 128>}]} {
    %c0 = arith.constant 0 : index
    %c0_0 = arith.constant 0 : index
    %0 = vector.load %arg1[%c0, %c0_0] : memref<8x32xf32, #tpu.memory_space<vmem>>, vector<8x32xf32>
    %c0_1 = arith.constant 0 : index
    %c0_2 = arith.constant 0 : index
    %1 = vector.load %arg2[%c0_1, %c0_2] : memref<32x128xbf16, #tpu.memory_space<vmem>>, vector<32x128xbf16>
    %c0_3 = arith.constant 0 : index
    %c0_4 = arith.constant 0 : index
    %2 = vector.load %arg3[%c0_3, %c0_4] : memref<1x128xf32, #tpu.memory_space<vmem>>, vector<1x128xf32>
    %3 = arith.truncf %0 : vector<8x32xf32> to vector<8x32xbf16>
    %cst = arith.constant dense<0.000000e+00> : vector<8x128xf32>
    %4 = tpu.matmul %3, %1, %cst {dimension_numbers = #tpu.dot_dimension_numbers<[1], [0], [0], [1], [0, 0, 1, 1], [], []>} : vector<8x32xbf16>, vector<32x128xbf16>, vector<8x128xf32> -> vector<8x128xf32>
    %5 = vector.broadcast %2 : vector<1x128xf32> to vector<8x128xf32>
    %6 = arith.addf %4, %5 : vector<8x128xf32>
    %cst_5 = arith.constant 0.000000e+00 : f32
    %7 = vector.broadcast %cst_5 : f32 to vector<8x128xf32>
    %8 = arith.maximumf %6, %7 : vector<8x128xf32>
    %c0_6 = arith.constant 0 : index
    %c0_7 = arith.constant 0 : index
    %9 = vector.load %arg4[%c0_6, %c0_7] : memref<128x128xbf16, #tpu.memory_space<vmem>>, vector<128x128xbf16>
    %c0_8 = arith.constant 0 : index
    %c0_9 = arith.constant 0 : index
    %10 = vector.load %arg5[%c0_8, %c0_9] : memref<1x128xf32, #tpu.memory_space<vmem>>, vector<1x128xf32>
    %11 = arith.truncf %8 : vector<8x128xf32> to vector<8x128xbf16>
    %cst_10 = arith.constant dense<0.000000e+00> : vector<8x128xf32>
    %12 = tpu.matmul %11, %9, %cst_10 {dimension_numbers = #tpu.dot_dimension_numbers<[1], [0], [0], [1], [0, 0, 1, 1], [], []>} : vector<8x128xbf16>, vector<128x128xbf16>, vector<8x128xf32> -> vector<8x128xf32>
    %13 = vector.broadcast %10 : vector<1x128xf32> to vector<8x128xf32>
    %14 = arith.addf %12, %13 : vector<8x128xf32>
    %cst_11 = arith.constant 0.000000e+00 : f32
    %15 = vector.broadcast %cst_11 : f32 to vector<8x128xf32>
    %16 = arith.maximumf %14, %15 : vector<8x128xf32>
    %c0_12 = arith.constant 0 : index
    %c0_13 = arith.constant 0 : index
    %17 = vector.load %arg6[%c0_12, %c0_13] : memref<128x128xbf16, #tpu.memory_space<vmem>>, vector<128x128xbf16>
    %c0_14 = arith.constant 0 : index
    %c0_15 = arith.constant 0 : index
    %18 = vector.load %arg7[%c0_14, %c0_15] : memref<1x128xf32, #tpu.memory_space<vmem>>, vector<1x128xf32>
    %19 = arith.truncf %16 : vector<8x128xf32> to vector<8x128xbf16>
    %cst_16 = arith.constant dense<0.000000e+00> : vector<8x128xf32>
    %20 = tpu.matmul %19, %17, %cst_16 {dimension_numbers = #tpu.dot_dimension_numbers<[1], [0], [0], [1], [0, 0, 1, 1], [], []>} : vector<8x128xbf16>, vector<128x128xbf16>, vector<8x128xf32> -> vector<8x128xf32>
    %21 = vector.broadcast %18 : vector<1x128xf32> to vector<8x128xf32>
    %22 = arith.addf %20, %21 : vector<8x128xf32>
    %23 = tpu.iota {dimensions = array<i32: 1>} : vector<8x128xi32>
    %c16_i32 = arith.constant 16 : i32
    %24 = vector.broadcast %c16_i32 : i32 to vector<8x128xi32>
    %25 = arith.cmpi slt, %23, %24 : vector<8x128xi32>
    %cst_17 = arith.constant 0xFF800000 : f32
    %26 = vector.broadcast %cst_17 : f32 to vector<8x128xf32>
    %27 = arith.select %25, %22, %26 : vector<8x128xi1>, vector<8x128xf32>
    %cst_18 = arith.constant dense<0xFF800000> : vector<8xf32>
    %28 = vector.multi_reduction <maximumf>, %27, %cst_18 [1] : vector<8x128xf32> to vector<8xf32>
    %29 = vector.shape_cast %28 : vector<8xf32> to vector<8x1xf32>
    %30 = vector.broadcast %29 : vector<8x1xf32> to vector<8x128xf32>
    %31 = arith.subf %27, %30 : vector<8x128xf32>
    %32 = math.exp %31 : vector<8x128xf32>
    %cst_19 = arith.constant dense<0.000000e+00> : vector<8xf32>
    %33 = vector.multi_reduction <add>, %32, %cst_19 [1] : vector<8x128xf32> to vector<8xf32>
    %34 = vector.shape_cast %33 : vector<8xf32> to vector<8x1xf32>
    %35 = math.log %34 : vector<8x1xf32>
    %36 = vector.broadcast %35 : vector<8x1xf32> to vector<8x128xf32>
    %37 = arith.subf %31, %36 : vector<8x128xf32>
    %cst_20 = arith.constant 0.000000e+00 : f32
    %38 = vector.broadcast %cst_20 : f32 to vector<8x128xf32>
    %39 = arith.select %25, %37, %38 : vector<8x128xi1>, vector<8x128xf32>
    %c0_21 = arith.constant 0 : index
    %c0_22 = arith.constant 0 : index
    %40 = vector.load %arg8[%c0_21, %c0_22] : memref<8x128xf32, #tpu.memory_space<vmem>>, vector<8x128xf32>
    tpu.vector_store %arg8[%c0_21, %c0_22], %39 {strides = array<i32>} : memref<8x128xf32, #tpu.memory_space<vmem>>, vector<8x128xf32>,
    return
  }
  func.func @transform_0(%arg0: i32) -> (i32, i32) {
    %c0_i32 = arith.constant 0 : i32
    %c0_i32_0 = arith.constant 0 : i32
    return %arg0, %c0_i32 : i32, i32
  }
  func.func @transform_1(%arg0: i32) -> (i32, i32) {
    %c0_i32 = arith.constant 0 : i32
    %c0_i32_0 = arith.constant 0 : i32
    %c0_i32_1 = arith.constant 0 : i32
    return %c0_i32, %c0_i32_0 : i32, i32
  }
  func.func @transform_2(%arg0: i32) -> (i32, i32) {
    %c0_i32 = arith.constant 0 : i32
    %c0_i32_0 = arith.constant 0 : i32
    %c0_i32_1 = arith.constant 0 : i32
    return %c0_i32, %c0_i32_0 : i32, i32
  }
  func.func @transform_3(%arg0: i32) -> (i32, i32) {
    %c0_i32 = arith.constant 0 : i32
    %c0_i32_0 = arith.constant 0 : i32
    %c0_i32_1 = arith.constant 0 : i32
    return %c0_i32, %c0_i32_0 : i32, i32
  }
  func.func @transform_4(%arg0: i32) -> (i32, i32) {
    %c0_i32 = arith.constant 0 : i32
    %c0_i32_0 = arith.constant 0 : i32
    %c0_i32_1 = arith.constant 0 : i32
    return %c0_i32, %c0_i32_0 : i32, i32
  }
  func.func @transform_5(%arg0: i32) -> (i32, i32) {
    %c0_i32 = arith.constant 0 : i32
    %c0_i32_0 = arith.constant 0 : i32
    %c0_i32_1 = arith.constant 0 : i32
    return %c0_i32, %c0_i32_0 : i32, i32
  }
  func.func @transform_6(%arg0: i32) -> (i32, i32) {
    %c0_i32 = arith.constant 0 : i32
    %c0_i32_0 = arith.constant 0 : i32
    %c0_i32_1 = arith.constant 0 : i32
    return %c0_i32, %c0_i32_0 : i32, i32
  }
  func.func @transform_7(%arg0: i32) -> (i32, i32) {
    %c0_i32 = arith.constant 0 : i32
    %c0_i32_0 = arith.constant 0 : i32
    return %arg0, %c0_i32 : i32, i32
  }
}

module attributes {stable_mosaic.version = 11 : i64} {
  func.func @kernel(%arg0: i32, %arg1: memref<8x32xf32, #tpu.memory_space<vmem>>, %arg2: memref<32x128xbf16, #tpu.memory_space<vmem>>, %arg3: memref<1x128xf32, #tpu.memory_space<vmem>>, %arg4: memref<128x128xbf16, #tpu.memory_space<vmem>>, %arg5: memref<1x128xf32, #tpu.memory_space<vmem>>, %arg6: memref<128x128xbf16, #tpu.memory_space<vmem>>, %arg7: memref<1x128xf32, #tpu.memory_space<vmem>>, %arg8: memref<8x128xf32, #tpu.memory_space<vmem>>) attributes {dimension_semantics = [#tpu.dimension_semantics<parallel>], iteration_bounds = array<i64: 1>, scalar_prefetch = 0 : i64, scratch_operands = 0 : i64, tpu.core_type = #tpu.core_type<tc>, window_params = [{transform_indices = @transform_0, window_bounds = array<i64: 8, 32>}, {pipeline_mode = #tpu.pipeline_mode<synchronous>, transform_indices = @transform_1, window_bounds = array<i64: 32, 128>}, {pipeline_mode = #tpu.pipeline_mode<synchronous>, transform_indices = @transform_2, window_bounds = array<i64: 1, 128>}, {pipeline_mode = #tpu.pipeline_mode<synchronous>, transform_indices = @transform_3, window_bounds = array<i64: 128, 128>}, {pipeline_mode = #tpu.pipeline_mode<synchronous>, transform_indices = @transform_4, window_bounds = array<i64: 1, 128>}, {pipeline_mode = #tpu.pipeline_mode<synchronous>, transform_indices = @transform_5, window_bounds = array<i64: 128, 128>}, {pipeline_mode = #tpu.pipeline_mode<synchronous>, transform_indices = @transform_6, window_bounds = array<i64: 1, 128>}, {transform_indices = @transform_7, window_bounds = array<i64: 8, 128>}]} {
    %c0 = arith.constant 0 : index
    %c0_0 = arith.constant 0 : index
    %0 = vector.load %arg1[%c0, %c0_0] : memref<8x32xf32, #tpu.memory_space<vmem>>, vector<8x32xf32>
    %c0_1 = arith.constant 0 : index
    %c0_2 = arith.constant 0 : index
    %1 = vector.load %arg2[%c0_1, %c0_2] : memref<32x128xbf16, #tpu.memory_space<vmem>>, vector<32x128xbf16>
    %c0_3 = arith.constant 0 : index
    %c0_4 = arith.constant 0 : index
    %2 = vector.load %arg3[%c0_3, %c0_4] : memref<1x128xf32, #tpu.memory_space<vmem>>, vector<1x128xf32>
    %3 = arith.truncf %0 : vector<8x32xf32> to vector<8x32xbf16>
    %cst = arith.constant dense<0.000000e+00> : vector<8x128xf32>
    %4 = tpu.matmul %3, %1, %cst {dimension_numbers = #tpu.dot_dimension_numbers<[1], [0], [0], [1], [0, 0, 1, 1], [], []>} : vector<8x32xbf16>, vector<32x128xbf16>, vector<8x128xf32> -> vector<8x128xf32>
    %5 = vector.broadcast %2 : vector<1x128xf32> to vector<8x128xf32>
    %6 = arith.addf %4, %5 : vector<8x128xf32>
    %cst_5 = arith.constant 0.000000e+00 : f32
    %7 = vector.broadcast %cst_5 : f32 to vector<8x128xf32>
    %8 = arith.maximumf %6, %7 : vector<8x128xf32>
    %c0_6 = arith.constant 0 : index
    %c0_7 = arith.constant 0 : index
    %9 = vector.load %arg4[%c0_6, %c0_7] : memref<128x128xbf16, #tpu.memory_space<vmem>>, vector<128x128xbf16>
    %c0_8 = arith.constant 0 : index
    %c0_9 = arith.constant 0 : index
    %10 = vector.load %arg5[%c0_8, %c0_9] : memref<1x128xf32, #tpu.memory_space<vmem>>, vector<1x128xf32>
    %11 = arith.truncf %8 : vector<8x128xf32> to vector<8x128xbf16>
    %cst_10 = arith.constant dense<0.000000e+00> : vector<8x128xf32>
    %12 = tpu.matmul %11, %9, %cst_10 {dimension_numbers = #tpu.dot_dimension_numbers<[1], [0], [0], [1], [0, 0, 1, 1], [], []>} : vector<8x128xbf16>, vector<128x128xbf16>, vector<8x128xf32> -> vector<8x128xf32>
    %13 = vector.broadcast %10 : vector<1x128xf32> to vector<8x128xf32>
    %14 = arith.addf %12, %13 : vector<8x128xf32>
    %cst_11 = arith.constant 0.000000e+00 : f32
    %15 = vector.broadcast %cst_11 : f32 to vector<8x128xf32>
    %16 = arith.maximumf %14, %15 : vector<8x128xf32>
    %c0_12 = arith.constant 0 : index
    %c0_13 = arith.constant 0 : index
    %17 = vector.load %arg6[%c0_12, %c0_13] : memref<128x128xbf16, #tpu.memory_space<vmem>>, vector<128x128xbf16>
    %c0_14 = arith.constant 0 : index
    %c0_15 = arith.constant 0 : index
    %18 = vector.load %arg7[%c0_14, %c0_15] : memref<1x128xf32, #tpu.memory_space<vmem>>, vector<1x128xf32>
    %19 = arith.truncf %16 : vector<8x128xf32> to vector<8x128xbf16>
    %cst_16 = arith.constant dense<0.000000e+00> : vector<8x128xf32>
    %20 = tpu.matmul %19, %17, %cst_16 {dimension_numbers = #tpu.dot_dimension_numbers<[1], [0], [0], [1], [0, 0, 1, 1], [], []>} : vector<8x128xbf16>, vector<128x128xbf16>, vector<8x128xf32> -> vector<8x128xf32>
    %21 = vector.broadcast %18 : vector<1x128xf32> to vector<8x128xf32>
    %22 = arith.addf %20, %21 : vector<8x128xf32>
    %23 = tpu.iota {dimensions = array<i32: 1>} : vector<8x128xi32>
    %c16_i32 = arith.constant 16 : i32
    %24 = vector.broadcast %c16_i32 : i32 to vector<8x128xi32>
    %25 = arith.cmpi slt, %23, %24 : vector<8x128xi32>
    %cst_17 = arith.constant 0xFF800000 : f32
    %26 = vector.broadcast %cst_17 : f32 to vector<8x128xf32>
    %27 = arith.select %25, %22, %26 : vector<8x128xi1>, vector<8x128xf32>
    %cst_18 = arith.constant dense<0xFF800000> : vector<8xf32>
    %28 = vector.multi_reduction <maximumf>, %27, %cst_18 [1] : vector<8x128xf32> to vector<8xf32>
    %29 = vector.shape_cast %28 : vector<8xf32> to vector<8x1xf32>
    %30 = vector.broadcast %29 : vector<8x1xf32> to vector<8x128xf32>
    %31 = arith.subf %27, %30 : vector<8x128xf32>
    %32 = math.exp %31 : vector<8x128xf32>
    %cst_19 = arith.constant dense<0.000000e+00> : vector<8xf32>
    %33 = vector.multi_reduction <add>, %32, %cst_19 [1] : vector<8x128xf32> to vector<8xf32>
    %34 = vector.shape_cast %33 : vector<8xf32> to vector<8x1xf32>
    %35 = math.log %34 : vector<8x1xf32>
    %36 = vector.broadcast %35 : vector<8x1xf32> to vector<8x128xf32>
    %37 = arith.subf %31, %36 : vector<8x128xf32>
    %cst_20 = arith.constant 0.000000e+00 : f32
    %38 = vector.broadcast %cst_20 : f32 to vector<8x128xf32>
    %39 = arith.select %25, %37, %38 : vector<8x128xi1>, vector<8x128xf32>
    %c0_21 = arith.constant 0 : index
    %c0_22 = arith.constant 0 : index
    %40 = vector.load %arg8[%c0_21, %c0_22] : memref<8x128xf32, #tpu.memory_space<vmem>>, vector<8x128xf32>
    tpu.vector_store %arg8[%c0_21, %c0_22], %39 {strides = array<i32>} : memref<8x128xf32, #tpu.memory_space<vmem>>, vector<8x128xf32>,
    return
  }
  func.func @transform_0(%arg0: i32) -> (i32, i32) {
    %c0_i32 = arith.constant 0 : i32
    %c0_i32_0 = arith.constant 0 : i32
    return %arg0, %c0_i32 : i32, i32
  }
  func.func @transform_1(%arg0: i32) -> (i32, i32) {
    %c0_i32 = arith.constant 0 : i32
    %c0_i32_0 = arith.constant 0 : i32
    %c0_i32_1 = arith.constant 0 : i32
    return %c0_i32, %c0_i32_0 : i32, i32
  }
  func.func @transform_2(%arg0: i32) -> (i32, i32) {
    %c0_i32 = arith.constant 0 : i32
    %c0_i32_0 = arith.constant 0 : i32
    %c0_i32_1 = arith.constant 0 : i32
    return %c0_i32, %c0_i32_0 : i32, i32
  }
  func.func @transform_3(%arg0: i32) -> (i32, i32) {
    %c0_i32 = arith.constant 0 : i32
    %c0_i32_0 = arith.constant 0 : i32
    %c0_i32_1 = arith.constant 0 : i32
    return %c0_i32, %c0_i32_0 : i32, i32
  }
  func.func @transform_4(%arg0: i32) -> (i32, i32) {
    %c0_i32 = arith.constant 0 : i32
    %c0_i32_0 = arith.constant 0 : i32
    %c0_i32_1 = arith.constant 0 : i32
    return %c0_i32, %c0_i32_0 : i32, i32
  }
  func.func @transform_5(%arg0: i32) -> (i32, i32) {
    %c0_i32 = arith.constant 0 : i32
    %c0_i32_0 = arith.constant 0 : i32
    %c0_i32_1 = arith.constant 0 : i32
    return %c0_i32, %c0_i32_0 : i32, i32
  }
  func.func @transform_6(%arg0: i32) -> (i32, i32) {
    %c0_i32 = arith.constant 0 : i32
    %c0_i32_0 = arith.constant 0 : i32
    %c0_i32_1 = arith.constant 0 : i32
    return %c0_i32, %c0_i32_0 : i32, i32
  }
  func.func @transform_7(%arg0: i32) -> (i32, i32) {
    %c0_i32 = arith.constant 0 : i32
    %c0_i32_0 = arith.constant 0 : i32
    return %arg0, %c0_i32 : i32, i32
  }
}

</mosaic_0001>

<bundles_post_ra>
// kernel: neural_network_forward.1
= control target key start
LH: loop header
LB: loop body
LE: loop exit
PB: predicated region body
PF: predicated region fallthrough
CT: control target
= control target key end

     0   :  { %12 = vsyncpa [#allocation3], 0  ;;  %s802_s0 = inlined_call_operand.hbm [shape: f32[8,32], index: 0, kind: input, shape index: {}]   ;;  %s803_s1 = inlined_call_operand.hbm [shape: bf16[32,128], index: 1, kind: input, shape index: {}]   ;;  %s804_s2 = inlined_call_operand.vmem [shape: f32[1,128], index: 2, kind: input, shape index: {}]   ;;  %s805_s3 = inlined_call_operand.hbm [shape: bf16[128,128], index: 3, kind: input, shape index: {}]   ;;  %s806_s4 = inlined_call_operand.vmem [shape: f32[1,128], index: 4, kind: input, shape index: {}]   ;;  %s807_s5 = inlined_call_operand.hbm [shape: bf16[128,128], index: 5, kind: input, shape index: {}]   ;;  %s808_s6 = inlined_call_operand.vmem [shape: f32[1,128], index: 6, kind: input, shape index: {}]   ;;  %s809_s7 = inlined_call_operand.hbm [shape: f32[8,128], index: 7, kind: output, shape index: {}]  }
   0x1   :  { %13 = vsyncpa [#allocation6], 0 }
   0x2   :  { %14 = vsyncpa [#allocation9], 0 }
   0x3   :  { %15 = vsyncpa [#allocation4], 0  ;;  %s649_s24 = smov [#allocation5]   ;;  %s531_s28 = scalar_lea.hbm %s803_s1, 256 }
   0x4   :  { %s31_s25 = sshll.u32 %s649_s24, 4  ;;  %p532_p0 = scmp.ne.s32.totalorder %s803_s1, %s531_s28  ;;  %s32_s25 = int_to_ptr.vmem [resolvable:$true] %s31_s25 }
   0x5   :  { %p535_p1 = scmp.lt.u32.totalorder %s531_s28, %s803_s1 }
   0x7   :  { %p537_p2 = pnand %p535_p1, %p532_p0 }
   0x9   :  { %540 = shalt.err (!%p537_p2)
}
   0xa   :  { %s541_s10 = scalar_lea.vmem %s32_s25, 256  ;;  %p546_p4 = scmp.lt.s32.totalorder %s32_s25, %s32_s25 }
   0xb   :  { %p542_p3 = scmp.ne.s32.totalorder %s32_s25, %s541_s10  ;;  %p547_p5 = scmp.lt.s32.totalorder %s541_s10, %s541_s10 }
   0xd   :  { %p548_p6 = por %p547_p5, %p546_p4 }
   0xf   :  { %p549_p7 = pnand %p548_p6, %p542_p3 }
  0x11   :  { %552 = shalt.err (!%p549_p7)
}
  0x12   :  { %s650_s11 = smov 64   ;;  %s651_s12 = smov 4  }
  0x13   :  { %37 = dma.hbm_to_vmem [thread:$0]  %s803_s1, 256, %s32_s25, [#allocation6], %s650_s11, %s650_s11, %s651_s12  }
  0x14   :  { %s652_s15 = smov [#allocation2]   ;;  %s653_s17 = smov [#allocation7]  }
  0x15   :  { %s22_s16 = sshll.u32 %s652_s15, 4  ;;  %s45_s18 = sshll.u32 %s653_s17, 4  ;;  %s23_s16 = int_to_ptr.vmem [resolvable:$true] %s22_s16  ;;  %s46_s18 = int_to_ptr.vmem [resolvable:$true] %s45_s18 }
  0x16   :  { %s553_s21 = scalar_lea.hbm %s802_s0, 128 }
  0x17   :  { %p554_p8 = scmp.ne.s32.totalorder %s802_s0, %s553_s21  ;;  %p557_p9 = scmp.lt.u32.totalorder %s553_s21, %s802_s0 }
  0x19   :  { %p559_p10 = pnand %p557_p9, %p554_p8 }
  0x1b   :  { %562 = shalt.err (!%p559_p10)
}
  0x1c   :  { %s563_s1 = scalar_lea.vmem %s23_s16, 128  ;;  %p568_p12 = scmp.lt.s32.totalorder %s23_s16, %s23_s16 }
  0x1d   :  { %p564_p11 = scmp.ne.s32.totalorder %s23_s16, %s563_s1  ;;  %p569_p13 = scmp.lt.s32.totalorder %s563_s1, %s563_s1 }
  0x1f   :  { %p570_p0 = por %p569_p13, %p568_p12 }
  0x21   :  { %p571_p1 = pnand %p570_p0, %p564_p11 }
  0x23   :  { %574 = shalt.err (!%p571_p1)
}
  0x24   :  { %25 = dma.hbm_to_vmem [thread:$0]  %s802_s0, 128, %s23_s16, [#allocation3]  }
  0x25   :  { %s575_s30 = scalar_lea.hbm %s805_s3, 1024 }
  0x26   :  { %p576_p2 = scmp.ne.s32.totalorder %s805_s3, %s575_s30  ;;  %p579_p3 = scmp.lt.u32.totalorder %s575_s30, %s805_s3 }
  0x28   :  { %p581_p4 = pnand %p579_p3, %p576_p2 }
  0x2a   :  { %584 = shalt.err (!%p581_p4)
}
  0x2b   :  { %s585_s14 = scalar_lea.vmem %s46_s18, 1024  ;;  %p590_p6 = scmp.lt.s32.totalorder %s46_s18, %s46_s18 }
  0x2c   :  { %p586_p5 = scmp.ne.s32.totalorder %s46_s18, %s585_s14  ;;  %p591_p7 = scmp.lt.s32.totalorder %s585_s14, %s585_s14 }
  0x2e   :  { %p592_p8 = por %p591_p7, %p590_p6 }
  0x30   :  { %p593_p9 = pnand %p592_p8, %p586_p5 }
  0x32   :  { %596 = shalt.err (!%p593_p9)
}
  0x33   :  { %51 = dma.hbm_to_vmem [thread:$0]  %s805_s3, 1024, %s46_s18, [#allocation6], %s650_s11, %s650_s11, %s651_s12  }
  0x34   :  { %s654_s16 = smov [#allocation8]   ;;  %s597_s21 = scalar_lea.hbm %s807_s5, 1024 }
  0x35   :  { %s59_s17 = sshll.u32 %s654_s16, 4  ;;  %p598_p10 = scmp.ne.s32.totalorder %s807_s5, %s597_s21  ;;  %s60_s17 = int_to_ptr.vmem [resolvable:$true] %s59_s17 }
  0x36   :  { %p601_p11 = scmp.lt.u32.totalorder %s597_s21, %s807_s5 }
  0x38   :  { %p603_p12 = pnand %p601_p11, %p598_p10 }
  0x3a   :  { %606 = shalt.err (!%p603_p12)
}
  0x3b   :  { %s607_s1 = scalar_lea.vmem %s60_s17, 1024  ;;  %p612_p0 = scmp.lt.s32.totalorder %s60_s17, %s60_s17 }
  0x3c   :  { %p608_p13 = scmp.ne.s32.totalorder %s60_s17, %s607_s1  ;;  %p613_p1 = scmp.lt.s32.totalorder %s607_s1, %s607_s1 }
  0x3e   :  { %p614_p2 = por %p613_p1, %p612_p0 }
  0x40   :  { %p615_p3 = pnand %p614_p2, %p608_p13 }
  0x42   :  { %618 = shalt.err (!%p615_p3)
}
  0x43   :  { %65 = dma.hbm_to_vmem [thread:$0]  %s807_s5, 1024, %s60_s17, [#allocation9], %s650_s11, %s650_s11, %s651_s12  }
  0x44   :  { %641 = dma.done.wait [#allocation3], 128  }
  0x45   :  { %642 = vsyncadd [#allocation3], 4294967168 }
  0x46   :  { %643 = dma.done.wait [#allocation6], 1280  }
  0x47   :  { %644 = vsyncadd [#allocation6], 4294966016 }
  0x48   :  { %645 = dma.done.wait [#allocation9], 1024  }
  0x49   :  { %646 = vsyncadd [#allocation9], 4294966272  ;;  %v655_v0 = vmov 0.0   ;;  %vm656_vm0 = vmmov 0   ;;  %v509_v1 = vld [vmem:[#allocation5] sm:$0xff]   ;;  %v510_v2 = vld [vmem:[#allocation5 + $0x8] sm:$0xff]   ;;  %v376_v37 = vlaneseq }
  0x4a   :  { %452 = vmatprep.subr.bf16.mxu0 %v655_v0  ;;  %456 = vmatprep.mubr.msk.bf16.mxu0 %vm656_vm0, %v655_v0  ;;  %v81_v3 = vld [vmem:[#allocation2] sm:$0xff]  ;;  %v511_v4 = vld [vmem:[#allocation7] sm:$0xff]   ;;  %vm106_vm1 = vcmask 261120   ;;  %v513_v7 = vld [vmem:[#allocation7 + $0x10] sm:$0xff]  }
  0x4b   :  { %460 = vmatprep.subr.bf16.mxu1 %v655_v0  ;;  %476 = vmatprep.mubr.msk.bf16.mxu1 %vm656_vm0, %v655_v0  ;;  %v87_v5 = vpack.c.bf16 %v81_v3, %v81_v3  ;;  %v512_v6 = vld [vmem:[#allocation7 + $0x8] sm:$0xff]   ;;  %v514_v8 = vld [vmem:[#allocation7 + $0x18] sm:$0xff]   ;;  %v515_v9 = vld [vmem:[#allocation7 + $0x20] sm:$0xff]   ;;  %v377_v38 = vand.u32 127, %v376_v37 }
  0x4c   :  { %453 = vmatpush3.bf16.msra.mxu0 %v509_v1  ;;  %461 = vmatpush3.bf16.msra.mxu1 %v511_v4  ;;  %v516_v10 = vld [vmem:[#allocation7 + $0x28] sm:$0xff]   ;;  %v517_v11 = vld [vmem:[#allocation7 + $0x30] sm:$0xff]   ;;  %v518_v12 = vld [vmem:[#allocation7 + $0x38] sm:$0xff]  }
  0x4d   :  { %454 = vmatprep.subr.bf16.mxu0 %v655_v0  ;;  %462 = vmatprep.subr.bf16.mxu1 %v655_v0  ;;  %v519_v13 = vld [vmem:[#allocation8] sm:$0xff]   ;;  %v520_v14 = vld [vmem:[#allocation8 + $0x8] sm:$0xff]   ;;  %v521_v15 = vld [vmem:[#allocation8 + $0x10] sm:$0xff]   ;;  %vm378_vm2 = vcmp.lt.s32.totalorder %v377_v38, 16 }
  0x4e   :  { %v522_v16 = vld [vmem:[#allocation8 + $0x18] sm:$0xff]   ;;  %v523_v17 = vld [vmem:[#allocation8 + $0x20] sm:$0xff]   ;;  %v524_v18 = vld [vmem:[#allocation8 + $0x28] sm:$0xff]  }
  0x4f   :  { %v409_v19 = vld [vmem:[%s804_s2] ss:$0 sm:$0xff]  ;;  %v525_v27 = vld [vmem:[#allocation8 + $0x30] sm:$0xff]   ;;  %v526_v28 = vld [vmem:[#allocation8 + $0x38] sm:$0xff]  }
  0x50   :  { %455 = vmatpush3.bf16.msra.mxu0 %v510_v2  ;;  %463 = vmatpush3.bf16.msra.mxu1 %v512_v6  ;;  %v413_v29 = vld [vmem:[%s806_s4] ss:$0 sm:$0xff]  ;;  %s657_s4 = smov [#allocation10]  }
  0x51   :  { %480 = vmatprep.subr.bf16.mxu0 %v655_v0  ;;  %464 = vmatprep.subr.bf16.mxu1 %v655_v0  ;;  %v422_v39 = vld [vmem:[%s808_s6] ss:$0 sm:$0xff]  ;;  %s398_s6 = sshll.u32 %s657_s4, 4  ;;  %s399_s6 = int_to_ptr.vmem [resolvable:$true] %s398_s6 }
  0x52   :  { %s619_s28 = scalar_lea.vmem %s399_s6, 128  ;;  %p624_p5 = scmp.lt.s32.totalorder %s399_s6, %s399_s6 }
  0x53   :  { %457 = vmatmul.mubr.msk.bf16.vlgmr.msra.gmra.mrb[0].mxu0 %vm106_vm1, %v87_v5  ;;  %p620_p4 = scmp.ne.s32.totalorder %s399_s6, %s619_s28  ;;  %p625_p6 = scmp.lt.s32.totalorder %s619_s28, %s619_s28 }
  0x54   :  { %496 = vmatprep.mubr.msk.bf16.mxu0 %vm656_vm0, %v655_v0  ;;  %465 = vmatpush3.bf16.msra.mxu1 %v513_v7 }
  0x55   :  { %466 = vmatprep.subr.bf16.mxu1 %v655_v0  ;;  %481 = vmatpush3.bf16.msra.mxu0 %v519_v13  ;;  %p626_p7 = por %p625_p6, %p624_p5 }
  0x56   :  { %482 = vmatprep.subr.bf16.mxu0 %v655_v0 }
  0x57   :  { %p627_p8 = pnand %p626_p7, %p620_p4 }
  0x58   :  { %467 = vmatpush3.bf16.msra.mxu1 %v514_v8 }
  0x59   :  { %468 = vmatprep.subr.bf16.mxu1 %v655_v0  ;;  %483 = vmatpush3.bf16.msra.mxu0 %v520_v14 }
  0x5a   :  { %484 = vmatprep.subr.bf16.mxu0 %v655_v0 }
  0x5c   :  { %469 = vmatpush3.bf16.msra.mxu1 %v515_v9 }
  0x5d   :  { %470 = vmatprep.subr.bf16.mxu1 %v655_v0  ;;  %485 = vmatpush3.bf16.msra.mxu0 %v521_v15 }
  0x5e   :  { %486 = vmatprep.subr.bf16.mxu0 %v655_v0 }
  0x60   :  { %471 = vmatpush3.bf16.msra.mxu1 %v516_v10 }
  0x61   :  { %472 = vmatprep.subr.bf16.mxu1 %v655_v0  ;;  %487 = vmatpush3.bf16.msra.mxu0 %v522_v16 }
  0x62   :  { %488 = vmatprep.subr.bf16.mxu0 %v655_v0 }
  0x64   :  { %473 = vmatpush3.bf16.msra.mxu1 %v517_v11 }
  0x65   :  { %474 = vmatprep.subr.bf16.mxu1 %v655_v0  ;;  %489 = vmatpush3.bf16.msra.mxu0 %v523_v17 }
  0x66   :  { %490 = vmatprep.subr.bf16.mxu0 %v655_v0 }
  0x68   :  { %475 = vmatpush3.bf16.msra.mxu1 %v518_v12 }
  0x69   :  { %491 = vmatpush3.bf16.msra.mxu0 %v524_v18 }
  0x6a   :  { %492 = vmatprep.subr.bf16.mxu0 %v655_v0 }
  0x6d   :  { %493 = vmatpush3.bf16.msra.mxu0 %v525_v27 }
  0x6e   :  { %494 = vmatprep.subr.bf16.mxu0 %v655_v0 }
  0x71   :  { %495 = vmatpush3.bf16.msra.mxu0 %v526_v28 }
 0x126   :  { %v144_v20 = vpop.f32.mrb[0].mxu0 }
 0x127   :  { %v145_v21 = vadd.f32 %v409_v19, %v144_v20  ;;  %v458_v22 = vpop.f32.mrb[1].mxu0 }
 0x128   :  { %v147_v23 = vpop.f32.mrb[2].mxu0 }
 0x129   :  { %v150_v24 = vmax.f32 %v145_v21, 0.0  ;;  %v459_v25 = vpop.f32.mrb[3].mxu0 }
 0x12b   :  { %v168_v26 = vpack.c.bf16 %v150_v24, %v150_v24 }
 0x12d   :  { %477 = vmatmul.mubr.bf16.vlgmr.msra.gmra.mrb[0].mxu1 %v168_v26 }
 0x200   :  { %v257_v30 = vpop.f32.mrb[0].mxu1 }
 0x201   :  { %v258_v31 = vadd.f32 %v413_v29, %v257_v30  ;;  %v478_v32 = vpop.f32.mrb[1].mxu1 }
 0x202   :  { %v260_v33 = vpop.f32.mrb[2].mxu1 }
 0x203   :  { %v263_v34 = vmax.f32 %v258_v31, 0.0  ;;  %v479_v35 = vpop.f32.mrb[3].mxu1 }
 0x205   :  { %v281_v36 = vpack.c.bf16 %v263_v34, %v263_v34 }
 0x207   :  { %497 = vmatmul.mubr.bf16.vlgmr.msra.gmra.mrb[4].mxu0 %v281_v36 }
 0x2da   :  { %v370_v40 = vpop.f32.mrb[4].mxu0 }
 0x2db   :  { %v371_v41 = vadd.f32 %v422_v39, %v370_v40  ;;  %v498_v42 = vpop.f32.mrb[5].mxu0 }
 0x2dc   :  { %v373_v43 = vpop.f32.mrb[6].mxu0 }
 0x2dd   :  { %v499_v44 = vpop.f32.mrb[7].mxu0  ;;  %v379_v45 = vsel %vm378_vm2, %v371_v41, -inf }
 0x2de   :  { %380 = vmax.xlane.f32.xlu0 %v379_v45 }
 0x36b   :  { %v381_v46 = vpop.xlane.xlu0 %380 }
 0x36c   :  { %v382_v47 = vsub.f32 %v379_v45, %v381_v46 }
 0x36e   :  { %v383_v48 = vmul.f32 1.442695, %v382_v47 }
 0x370   :  { %527 = vpow2.f32 %v383_v48 }
 0x37a   :  { %v528_v49 = vpop.eup %527 }
 0x37b   :  { %385 = vadd.xlane.f32.xlu0 %v528_v49 }
 0x408   :  { %v386_v50 = vpop.xlane.xlu0 %385 }
 0x409   :  { %529 = vlog2.f32 %v386_v50 }
 0x413   :  { %v530_v51 = vpop.eup %529 }
 0x414   :  { %v388_v52 = vmul.f32 0.6931472, %v530_v51 }
 0x416   :  { %v389_v53 = vsub.f32 %v382_v47, %v388_v52 }
 0x418   :  { %v390_v54 = vsel %vm378_vm2, %v389_v53, 0.0 }
 0x419   :  { %391 = vst [vmem:[#allocation10] sm:$0xff] %v390_v54 }
 0x41a   :  { %630 = shalt.err (!%p627_p8)
}
 0x41b   :  { %s631_s8 = scalar_lea.hbm %s809_s7, 128 }
 0x41c   :  { %p632_p9 = scmp.ne.s32.totalorder %s809_s7, %s631_s8  ;;  %p635_p10 = scmp.lt.u32.totalorder %s631_s8, %s809_s7 }
 0x41e   :  { %p637_p11 = pnand %p635_p10, %p632_p9 }
 0x420   :  { %640 = shalt.err (!%p637_p11)
}
 0x421   :  { %401 = dma.vmem_to_hbm [thread:$0]  %s399_s6, 128, %s809_s7, [#allocation4]  }
 0x422   :  { %647 = dma.done.wait [#allocation4], 128  }
 0x423   :  { %648 = vsyncadd [#allocation4], 4294967168 }
 0x424   :  { %405 = vsyncpa [#allocation3], 1 }
 0x425   :  { %406 = vsyncpa [#allocation6], 1 }
 0x426   :  { %407 = vsyncpa [#allocation9], 1 }
 0x427   :  { %408 = vsyncpa [#allocation4], 1 }

// kernel: neural_network_forward.1
= control target key start
LH: loop header
LB: loop body
LE: loop exit
PB: predicated region body
PF: predicated region fallthrough
CT: control target
= control target key end

     0   :  { %12 = vsyncpa [#allocation3], 0  ;;  %s802_s0 = inlined_call_operand.hbm [shape: f32[8,32], index: 0, kind: input, shape index: {}]   ;;  %s803_s1 = inlined_call_operand.hbm [shape: bf16[32,128], index: 1, kind: input, shape index: {}]   ;;  %s804_s2 = inlined_call_operand.vmem [shape: f32[1,128], index: 2, kind: input, shape index: {}]   ;;  %s805_s3 = inlined_call_operand.hbm [shape: bf16[128,128], index: 3, kind: input, shape index: {}]   ;;  %s806_s4 = inlined_call_operand.vmem [shape: f32[1,128], index: 4, kind: input, shape index: {}]   ;;  %s807_s5 = inlined_call_operand.hbm [shape: bf16[128,128], index: 5, kind: input, shape index: {}]   ;;  %s808_s6 = inlined_call_operand.vmem [shape: f32[1,128], index: 6, kind: input, shape index: {}]   ;;  %s809_s7 = inlined_call_operand.hbm [shape: f32[8,128], index: 7, kind: output, shape index: {}]  }
   0x1   :  { %13 = vsyncpa [#allocation6], 0 }
   0x2   :  { %14 = vsyncpa [#allocation9], 0 }
   0x3   :  { %15 = vsyncpa [#allocation4], 0  ;;  %s649_s24 = smov [#allocation5]   ;;  %s531_s28 = scalar_lea.hbm %s803_s1, 256 }
   0x4   :  { %s31_s25 = sshll.u32 %s649_s24, 4  ;;  %p532_p0 = scmp.ne.s32.totalorder %s803_s1, %s531_s28  ;;  %s32_s25 = int_to_ptr.vmem [resolvable:$true] %s31_s25 }
   0x5   :  { %p535_p1 = scmp.lt.u32.totalorder %s531_s28, %s803_s1 }
   0x7   :  { %p537_p2 = pnand %p535_p1, %p532_p0 }
   0x9   :  { %540 = shalt.err (!%p537_p2)
}
   0xa   :  { %s541_s10 = scalar_lea.vmem %s32_s25, 256  ;;  %p546_p4 = scmp.lt.s32.totalorder %s32_s25, %s32_s25 }
   0xb   :  { %p542_p3 = scmp.ne.s32.totalorder %s32_s25, %s541_s10  ;;  %p547_p5 = scmp.lt.s32.totalorder %s541_s10, %s541_s10 }
   0xd   :  { %p548_p6 = por %p547_p5, %p546_p4 }
   0xf   :  { %p549_p7 = pnand %p548_p6, %p542_p3 }
  0x11   :  { %552 = shalt.err (!%p549_p7)
}
  0x12   :  { %s650_s11 = smov 64   ;;  %s651_s12 = smov 4  }
  0x13   :  { %37 = dma.hbm_to_vmem [thread:$0]  %s803_s1, 256, %s32_s25, [#allocation6], %s650_s11, %s650_s11, %s651_s12  }
  0x14   :  { %s652_s15 = smov [#allocation2]   ;;  %s653_s17 = smov [#allocation7]  }
  0x15   :  { %s22_s16 = sshll.u32 %s652_s15, 4  ;;  %s45_s18 = sshll.u32 %s653_s17, 4  ;;  %s23_s16 = int_to_ptr.vmem [resolvable:$true] %s22_s16  ;;  %s46_s18 = int_to_ptr.vmem [resolvable:$true] %s45_s18 }
  0x16   :  { %s553_s21 = scalar_lea.hbm %s802_s0, 128 }
  0x17   :  { %p554_p8 = scmp.ne.s32.totalorder %s802_s0, %s553_s21  ;;  %p557_p9 = scmp.lt.u32.totalorder %s553_s21, %s802_s0 }
  0x19   :  { %p559_p10 = pnand %p557_p9, %p554_p8 }
  0x1b   :  { %562 = shalt.err (!%p559_p10)
}
  0x1c   :  { %s563_s1 = scalar_lea.vmem %s23_s16, 128  ;;  %p568_p12 = scmp.lt.s32.totalorder %s23_s16, %s23_s16 }
  0x1d   :  { %p564_p11 = scmp.ne.s32.totalorder %s23_s16, %s563_s1  ;;  %p569_p13 = scmp.lt.s32.totalorder %s563_s1, %s563_s1 }
  0x1f   :  { %p570_p0 = por %p569_p13, %p568_p12 }
  0x21   :  { %p571_p1 = pnand %p570_p0, %p564_p11 }
  0x23   :  { %574 = shalt.err (!%p571_p1)
}
  0x24   :  { %25 = dma.hbm_to_vmem [thread:$0]  %s802_s0, 128, %s23_s16, [#allocation3]  }
  0x25   :  { %s575_s30 = scalar_lea.hbm %s805_s3, 1024 }
  0x26   :  { %p576_p2 = scmp.ne.s32.totalorder %s805_s3, %s575_s30  ;;  %p579_p3 = scmp.lt.u32.totalorder %s575_s30, %s805_s3 }
  0x28   :  { %p581_p4 = pnand %p579_p3, %p576_p2 }
  0x2a   :  { %584 = shalt.err (!%p581_p4)
}
  0x2b   :  { %s585_s14 = scalar_lea.vmem %s46_s18, 1024  ;;  %p590_p6 = scmp.lt.s32.totalorder %s46_s18, %s46_s18 }
  0x2c   :  { %p586_p5 = scmp.ne.s32.totalorder %s46_s18, %s585_s14  ;;  %p591_p7 = scmp.lt.s32.totalorder %s585_s14, %s585_s14 }
  0x2e   :  { %p592_p8 = por %p591_p7, %p590_p6 }
  0x30   :  { %p593_p9 = pnand %p592_p8, %p586_p5 }
  0x32   :  { %596 = shalt.err (!%p593_p9)
}
  0x33   :  { %51 = dma.hbm_to_vmem [thread:$0]  %s805_s3, 1024, %s46_s18, [#allocation6], %s650_s11, %s650_s11, %s651_s12  }
  0x34   :  { %s654_s16 = smov [#allocation8]   ;;  %s597_s21 = scalar_lea.hbm %s807_s5, 1024 }
  0x35   :  { %s59_s17 = sshll.u32 %s654_s16, 4  ;;  %p598_p10 = scmp.ne.s32.totalorder %s807_s5, %s597_s21  ;;  %s60_s17 = int_to_ptr.vmem [resolvable:$true] %s59_s17 }
  0x36   :  { %p601_p11 = scmp.lt.u32.totalorder %s597_s21, %s807_s5 }
  0x38   :  { %p603_p12 = pnand %p601_p11, %p598_p10 }
  0x3a   :  { %606 = shalt.err (!%p603_p12)
}
  0x3b   :  { %s607_s1 = scalar_lea.vmem %s60_s17, 1024  ;;  %p612_p0 = scmp.lt.s32.totalorder %s60_s17, %s60_s17 }
  0x3c   :  { %p608_p13 = scmp.ne.s32.totalorder %s60_s17, %s607_s1  ;;  %p613_p1 = scmp.lt.s32.totalorder %s607_s1, %s607_s1 }
  0x3e   :  { %p614_p2 = por %p613_p1, %p612_p0 }
  0x40   :  { %p615_p3 = pnand %p614_p2, %p608_p13 }
  0x42   :  { %618 = shalt.err (!%p615_p3)
}
  0x43   :  { %65 = dma.hbm_to_vmem [thread:$0]  %s807_s5, 1024, %s60_s17, [#allocation9], %s650_s11, %s650_s11, %s651_s12  }
  0x44   :  { %641 = dma.done.wait [#allocation3], 128  }
  0x45   :  { %642 = vsyncadd [#allocation3], 4294967168 }
  0x46   :  { %643 = dma.done.wait [#allocation6], 1280  }
  0x47   :  { %644 = vsyncadd [#allocation6], 4294966016 }
  0x48   :  { %645 = dma.done.wait [#allocation9], 1024  }
  0x49   :  { %646 = vsyncadd [#allocation9], 4294966272  ;;  %v655_v0 = vmov 0.0   ;;  %vm656_vm0 = vmmov 0   ;;  %v509_v1 = vld [vmem:[#allocation5] sm:$0xff]   ;;  %v510_v2 = vld [vmem:[#allocation5 + $0x8] sm:$0xff]   ;;  %v376_v37 = vlaneseq }
  0x4a   :  { %452 = vmatprep.subr.bf16.mxu0 %v655_v0  ;;  %456 = vmatprep.mubr.msk.bf16.mxu0 %vm656_vm0, %v655_v0  ;;  %v81_v3 = vld [vmem:[#allocation2] sm:$0xff]  ;;  %v511_v4 = vld [vmem:[#allocation7] sm:$0xff]   ;;  %vm106_vm1 = vcmask 261120   ;;  %v513_v7 = vld [vmem:[#allocation7 + $0x10] sm:$0xff]  }
  0x4b   :  { %460 = vmatprep.subr.bf16.mxu1 %v655_v0  ;;  %476 = vmatprep.mubr.msk.bf16.mxu1 %vm656_vm0, %v655_v0  ;;  %v87_v5 = vpack.c.bf16 %v81_v3, %v81_v3  ;;  %v512_v6 = vld [vmem:[#allocation7 + $0x8] sm:$0xff]   ;;  %v514_v8 = vld [vmem:[#allocation7 + $0x18] sm:$0xff]   ;;  %v515_v9 = vld [vmem:[#allocation7 + $0x20] sm:$0xff]   ;;  %v377_v38 = vand.u32 127, %v376_v37 }
  0x4c   :  { %453 = vmatpush3.bf16.msra.mxu0 %v509_v1  ;;  %461 = vmatpush3.bf16.msra.mxu1 %v511_v4  ;;  %v516_v10 = vld [vmem:[#allocation7 + $0x28] sm:$0xff]   ;;  %v517_v11 = vld [vmem:[#allocation7 + $0x30] sm:$0xff]   ;;  %v518_v12 = vld [vmem:[#allocation7 + $0x38] sm:$0xff]  }
  0x4d   :  { %454 = vmatprep.subr.bf16.mxu0 %v655_v0  ;;  %462 = vmatprep.subr.bf16.mxu1 %v655_v0  ;;  %v519_v13 = vld [vmem:[#allocation8] sm:$0xff]   ;;  %v520_v14 = vld [vmem:[#allocation8 + $0x8] sm:$0xff]   ;;  %v521_v15 = vld [vmem:[#allocation8 + $0x10] sm:$0xff]   ;;  %vm378_vm2 = vcmp.lt.s32.totalorder %v377_v38, 16 }
  0x4e   :  { %v522_v16 = vld [vmem:[#allocation8 + $0x18] sm:$0xff]   ;;  %v523_v17 = vld [vmem:[#allocation8 + $0x20] sm:$0xff]   ;;  %v524_v18 = vld [vmem:[#allocation8 + $0x28] sm:$0xff]  }
  0x4f   :  { %v409_v19 = vld [vmem:[%s804_s2] ss:$0 sm:$0xff]  ;;  %v525_v27 = vld [vmem:[#allocation8 + $0x30] sm:$0xff]   ;;  %v526_v28 = vld [vmem:[#allocation8 + $0x38] sm:$0xff]  }
  0x50   :  { %455 = vmatpush3.bf16.msra.mxu0 %v510_v2  ;;  %463 = vmatpush3.bf16.msra.mxu1 %v512_v6  ;;  %v413_v29 = vld [vmem:[%s806_s4] ss:$0 sm:$0xff]  ;;  %s657_s4 = smov [#allocation10]  }
  0x51   :  { %480 = vmatprep.subr.bf16.mxu0 %v655_v0  ;;  %464 = vmatprep.subr.bf16.mxu1 %v655_v0  ;;  %v422_v39 = vld [vmem:[%s808_s6] ss:$0 sm:$0xff]  ;;  %s398_s6 = sshll.u32 %s657_s4, 4  ;;  %s399_s6 = int_to_ptr.vmem [resolvable:$true] %s398_s6 }
  0x52   :  { %s619_s28 = scalar_lea.vmem %s399_s6, 128  ;;  %p624_p5 = scmp.lt.s32.totalorder %s399_s6, %s399_s6 }
  0x53   :  { %457 = vmatmul.mubr.msk.bf16.vlgmr.msra.gmra.mrb[0].mxu0 %vm106_vm1, %v87_v5  ;;  %p620_p4 = scmp.ne.s32.totalorder %s399_s6, %s619_s28  ;;  %p625_p6 = scmp.lt.s32.totalorder %s619_s28, %s619_s28 }
  0x54   :  { %496 = vmatprep.mubr.msk.bf16.mxu0 %vm656_vm0, %v655_v0  ;;  %465 = vmatpush3.bf16.msra.mxu1 %v513_v7 }
  0x55   :  { %466 = vmatprep.subr.bf16.mxu1 %v655_v0  ;;  %481 = vmatpush3.bf16.msra.mxu0 %v519_v13  ;;  %p626_p7 = por %p625_p6, %p624_p5 }
  0x56   :  { %482 = vmatprep.subr.bf16.mxu0 %v655_v0 }
  0x57   :  { %p627_p8 = pnand %p626_p7, %p620_p4 }
  0x58   :  { %467 = vmatpush3.bf16.msra.mxu1 %v514_v8 }
  0x59   :  { %468 = vmatprep.subr.bf16.mxu1 %v655_v0  ;;  %483 = vmatpush3.bf16.msra.mxu0 %v520_v14 }
  0x5a   :  { %484 = vmatprep.subr.bf16.mxu0 %v655_v0 }
  0x5c   :  { %469 = vmatpush3.bf16.msra.mxu1 %v515_v9 }
  0x5d   :  { %470 = vmatprep.subr.bf16.mxu1 %v655_v0  ;;  %485 = vmatpush3.bf16.msra.mxu0 %v521_v15 }
  0x5e   :  { %486 = vmatprep.subr.bf16.mxu0 %v655_v0 }
  0x60   :  { %471 = vmatpush3.bf16.msra.mxu1 %v516_v10 }
  0x61   :  { %472 = vmatprep.subr.bf16.mxu1 %v655_v0  ;;  %487 = vmatpush3.bf16.msra.mxu0 %v522_v16 }
  0x62   :  { %488 = vmatprep.subr.bf16.mxu0 %v655_v0 }
  0x64   :  { %473 = vmatpush3.bf16.msra.mxu1 %v517_v11 }
  0x65   :  { %474 = vmatprep.subr.bf16.mxu1 %v655_v0  ;;  %489 = vmatpush3.bf16.msra.mxu0 %v523_v17 }
  0x66   :  { %490 = vmatprep.subr.bf16.mxu0 %v655_v0 }
  0x68   :  { %475 = vmatpush3.bf16.msra.mxu1 %v518_v12 }
  0x69   :  { %491 = vmatpush3.bf16.msra.mxu0 %v524_v18 }
  0x6a   :  { %492 = vmatprep.subr.bf16.mxu0 %v655_v0 }
  0x6d   :  { %493 = vmatpush3.bf16.msra.mxu0 %v525_v27 }
  0x6e   :  { %494 = vmatprep.subr.bf16.mxu0 %v655_v0 }
  0x71   :  { %495 = vmatpush3.bf16.msra.mxu0 %v526_v28 }
 0x126   :  { %v144_v20 = vpop.f32.mrb[0].mxu0 }
 0x127   :  { %v145_v21 = vadd.f32 %v409_v19, %v144_v20  ;;  %v458_v22 = vpop.f32.mrb[1].mxu0 }
 0x128   :  { %v147_v23 = vpop.f32.mrb[2].mxu0 }
 0x129   :  { %v150_v24 = vmax.f32 %v145_v21, 0.0  ;;  %v459_v25 = vpop.f32.mrb[3].mxu0 }
 0x12b   :  { %v168_v26 = vpack.c.bf16 %v150_v24, %v150_v24 }
 0x12d   :  { %477 = vmatmul.mubr.bf16.vlgmr.msra.gmra.mrb[0].mxu1 %v168_v26 }
 0x200   :  { %v257_v30 = vpop.f32.mrb[0].mxu1 }
 0x201   :  { %v258_v31 = vadd.f32 %v413_v29, %v257_v30  ;;  %v478_v32 = vpop.f32.mrb[1].mxu1 }
 0x202   :  { %v260_v33 = vpop.f32.mrb[2].mxu1 }
 0x203   :  { %v263_v34 = vmax.f32 %v258_v31, 0.0  ;;  %v479_v35 = vpop.f32.mrb[3].mxu1 }
 0x205   :  { %v281_v36 = vpack.c.bf16 %v263_v34, %v263_v34 }
 0x207   :  { %497 = vmatmul.mubr.bf16.vlgmr.msra.gmra.mrb[4].mxu0 %v281_v36 }
 0x2da   :  { %v370_v40 = vpop.f32.mrb[4].mxu0 }
 0x2db   :  { %v371_v41 = vadd.f32 %v422_v39, %v370_v40  ;;  %v498_v42 = vpop.f32.mrb[5].mxu0 }
 0x2dc   :  { %v373_v43 = vpop.f32.mrb[6].mxu0 }
 0x2dd   :  { %v499_v44 = vpop.f32.mrb[7].mxu0  ;;  %v379_v45 = vsel %vm378_vm2, %v371_v41, -inf }
 0x2de   :  { %380 = vmax.xlane.f32.xlu0 %v379_v45 }
 0x36b   :  { %v381_v46 = vpop.xlane.xlu0 %380 }
 0x36c   :  { %v382_v47 = vsub.f32 %v379_v45, %v381_v46 }
 0x36e   :  { %v383_v48 = vmul.f32 1.442695, %v382_v47 }
 0x370   :  { %527 = vpow2.f32 %v383_v48 }
 0x37a   :  { %v528_v49 = vpop.eup %527 }
 0x37b   :  { %385 = vadd.xlane.f32.xlu0 %v528_v49 }
 0x408   :  { %v386_v50 = vpop.xlane.xlu0 %385 }
 0x409   :  { %529 = vlog2.f32 %v386_v50 }
 0x413   :  { %v530_v51 = vpop.eup %529 }
 0x414   :  { %v388_v52 = vmul.f32 0.6931472, %v530_v51 }
 0x416   :  { %v389_v53 = vsub.f32 %v382_v47, %v388_v52 }
 0x418   :  { %v390_v54 = vsel %vm378_vm2, %v389_v53, 0.0 }
 0x419   :  { %391 = vst [vmem:[#allocation10] sm:$0xff] %v390_v54 }
 0x41a   :  { %630 = shalt.err (!%p627_p8)
}
 0x41b   :  { %s631_s8 = scalar_lea.hbm %s809_s7, 128 }
 0x41c   :  { %p632_p9 = scmp.ne.s32.totalorder %s809_s7, %s631_s8  ;;  %p635_p10 = scmp.lt.u32.totalorder %s631_s8, %s809_s7 }
 0x41e   :  { %p637_p11 = pnand %p635_p10, %p632_p9 }
 0x420   :  { %640 = shalt.err (!%p637_p11)
}
 0x421   :  { %401 = dma.vmem_to_hbm [thread:$0]  %s399_s6, 128, %s809_s7, [#allocation4]  }
 0x422   :  { %647 = dma.done.wait [#allocation4], 128  }
 0x423   :  { %648 = vsyncadd [#allocation4], 4294967168 }
 0x424   :  { %405 = vsyncpa [#allocation3], 1 }
 0x425   :  { %406 = vsyncpa [#allocation6], 1 }
 0x426   :  { %407 = vsyncpa [#allocation9], 1 }
 0x427   :  { %408 = vsyncpa [#allocation4], 1 }

</bundles_post_ra>
